<compile_context>
chip_gen: v6e
topology: v6e:2x2x1
jax: 0.10.0
libtpu: 0.0.40
codegen_flags: <defaults>
</compile_context>

<pallas_src>
import functools

import jax
import jax.numpy as jnp
from jax.experimental import pallas as pl
from jax.experimental.pallas import tpu as pltpu

LANE = 128
SUBLANE = 8
MAX_ROWS_PER_TILE = 1024  # (1024,128) f32 tile = 512 KiB; 4 inputs x 2 bufs = 4 MiB


def _informed_loss_kernel(*refs, q, normalize):
    """Grid = (nchunk, steps). Accumulates per-lane partial sums per chunk."""
    if normalize:
        xh_ref, x_ref, sg_ref, mk_ref, o_sq, o_pw, o_mk, a_sq, a_pw, a_mk = refs
    else:
        xh_ref, x_ref, mk_ref, o_sq, o_pw, o_mk, a_sq, a_pw, a_mk = refs

    step = pl.program_id(1)

    @pl.when(step == 0)
    def _():
        a_sq[...] = jnp.zeros_like(a_sq)
        a_pw[...] = jnp.zeros_like(a_pw)
        a_mk[...] = jnp.zeros_like(a_mk)

    xh = xh_ref[...].astype(jnp.float32)
    x = x_ref[...].astype(jnp.float32)
    m = mk_ref[...].astype(jnp.float32)

    if normalize:
        inv_sg = 1.0 / sg_ref[...].astype(jnp.float32)  # one divide, reused twice
        diff = (xh - x) * inv_sg
        bg = xh * inv_sg
    else:
        # normalize=False: sigma is not streamed at all (divide by 1 is a no-op).
        diff = xh - x
        bg = xh

    t1 = m * diff                      # mask * (x_hat - x) / sigma
    t2 = jnp.abs((1.0 - m) * bg)       # |(1 - mask) * x_hat / sigma|

    # Specialize the power term on the trace-time constant q (q > 0 assumed).
    if q == 1.0:
        pw = t2
    elif q == 2.0:
        pw = t2 * t2
    else:
        pw = jnp.power(t2, jnp.float32(q))

    # Per-lane accumulation: (tm,128) -> (tm/8, 8, 128) is a free row-grouping
    # reshape; sum over axis 0 is pure vreg adds (VPU), no cross-lane reduce.
    nsub = t1.shape[0] // SUBLANE
    a_sq[...] += (t1 * t1).reshape(nsub, SUBLANE, LANE).sum(axis=0)
    a_pw[...] += pw.reshape(nsub, SUBLANE, LANE).sum(axis=0)
    a_mk[...] += m.reshape(nsub, SUBLANE, LANE).sum(axis=0)

    @pl.when(step == pl.num_programs(1) - 1)
    def _():
        # Lane-dense (8,128) partial-sum writeback, once per chunk.
        o_sq[...] = a_sq[...]
        o_pw[...] = a_pw[...]
        o_mk[...] = a_mk[...]


def _as_lane_slab(a, rows_padded, pad_value):
    """Flatten to (rows_padded, LANE); pad tail with `pad_value` only if needed."""
    flat = a.reshape(-1)  # keep original dtype (no forced f32 upcast in HBM)
    need = rows_padded * LANE - flat.shape[0]
    if need:
        flat = jnp.pad(flat, (0, need), constant_values=pad_value)
    return flat.reshape(rows_padded, LANE)


def informed_loss(x_hat, y_hat, x, sigma, mask, *, q=1.0, normalize=True):
    """Pallas implementation of InformedLoss.forward. y_hat is unused (as in torch)."""
    del y_hat  # unused by the reference forward
    numel = mask.size

    rows = pl.cdiv(numel, LANE)
    tm = min(MAX_ROWS_PER_TILE, pl.cdiv(rows, SUBLANE) * SUBLANE)
    num_blocks = pl.cdiv(rows, tm)
    nchunk = 2 if num_blocks >= 2 else 1          # megacore split on v7x
    num_blocks_padded = pl.cdiv(num_blocks, nchunk) * nchunk
    steps = num_blocks_padded // nchunk
    rows_padded = num_blocks_padded * tm

    # Zero padding contributes 0 to every sum (q > 0); sigma padded with 1.0
    # so the padded region never divides by zero (no extra ones/where pass).
    inputs = [
        _as_lane_slab(x_hat, rows_padded, 0),
        _as_lane_slab(x, rows_padded, 0),
    ]
    if normalize:
        inputs.append(_as_lane_slab(sigma, rows_padded, 1))
    inputs.append(_as_lane_slab(mask, rows_padded, 0))

    tile_spec = pl.BlockSpec((tm, LANE), lambda c, i: (c * steps + i, 0))
    out_spec = pl.BlockSpec((SUBLANE, LANE), lambda c, i: (c, 0))
    part_shape = jax.ShapeDtypeStruct((nchunk * SUBLANE, LANE), jnp.float32)

    o_sq, o_pw, o_mk = pl.pallas_call(
        functools.partial(_informed_loss_kernel,
                          q=float(q), normalize=bool(normalize)),
        out_shape=(part_shape, part_shape, part_shape),
        grid_spec=pltpu.PrefetchScalarGridSpec(
            num_scalar_prefetch=0,
            grid=(nchunk, steps),
            in_specs=[tile_spec] * len(inputs),
            out_specs=[out_spec, out_spec, out_spec],
            scratch_shapes=[pltpu.VMEM((SUBLANE, LANE), jnp.float32)] * 3,
        ),
        compiler_params=pltpu.CompilerParams(
            dimension_semantics=("parallel", "arbitrary")),
    )(*inputs)

    n1 = jnp.sum(o_mk)
    n0 = jnp.float32(numel) - n1
    loss = jnp.sum(o_sq) / (n1 + 1.0) + jnp.sum(o_pw) / (n0 + 1.0)
    return (loss,)


def _reference(x_hat, y_hat, x, sigma, mask, q=1.0, normalize=True):
    """Plain-JAX reference mirroring the PyTorch forward (float32)."""
    del y_hat
    n1 = mask.sum()
    n0 = mask.size - n1
    if not normalize:
        sigma = 0.0 * sigma + 1.0
    term1 = jnp.sum(jnp.square(mask * (x_hat - x) / sigma))
    term2 = jnp.sum(jnp.power(jnp.abs((1 - mask) * x_hat / sigma), q))
    return term1 / (n1 + 1) + term2 / (n0 + 1)


if __name__ == "__main__":
    key = jax.random.PRNGKey(0)
    k1, k2, k3, k4 = jax.random.split(key, 4)

    B, C, H, W = 2, 4, 16, 16  # NCHW, like the PyTorch module's inputs
    x_hat = jax.random.normal(k1, (B, C, H, W), jnp.float32)
    x = jax.random.normal(k2, (B, C, H, W), jnp.float32)
    sigma = jax.random.uniform(k3, (B, C, H, W), jnp.float32,
                               minval=0.5, maxval=1.5)
    mask = (jax.random.uniform(k4, (B, C, H, W)) > 0.7).astype(jnp.float32)
    y_hat = jnp.zeros_like(x_hat)  # unused by the loss

    for q_, norm_ in ((1.0, True), (2.0, True), (1.0, False)):
        (loss,) = informed_loss(x_hat, y_hat, x, sigma, mask,
                                q=q_, normalize=norm_)
        loss = jax.block_until_ready(loss)
        ref = _reference(x_hat, y_hat, x, sigma, mask, q=q_, normalize=norm_)
        assert jnp.allclose(loss, ref, rtol=1e-5, atol=1e-5), (q_, norm_, loss, ref)

    print("KERNEL_OK")
</pallas_src>

<mosaic_0001>
module attributes {stable_mosaic.version = 11 : i64} {
  func.func @_informed_loss_kernel(%arg0: i32, %arg1: i32, %arg2: memref<16x128xf32, #tpu.memory_space<vmem>>, %arg3: memref<16x128xf32, #tpu.memory_space<vmem>>, %arg4: memref<16x128xf32, #tpu.memory_space<vmem>>, %arg5: memref<16x128xf32, #tpu.memory_space<vmem>>, %arg6: memref<8x128xf32, #tpu.memory_space<vmem>>, %arg7: memref<8x128xf32, #tpu.memory_space<vmem>>, %arg8: memref<8x128xf32, #tpu.memory_space<vmem>>, %arg9: memref<8x128xf32, #tpu.memory_space<vmem>>, %arg10: memref<8x128xf32, #tpu.memory_space<vmem>>, %arg11: memref<8x128xf32, #tpu.memory_space<vmem>>) attributes {dimension_semantics = [#tpu.dimension_semantics<parallel>, #tpu.dimension_semantics<arbitrary>], iteration_bounds = array<i64: 1, 1>, scalar_prefetch = 0 : i64, scratch_operands = 3 : i64, tpu.core_type = #tpu.core_type<tc>, window_params = [{transform_indices = @transform_0, window_bounds = array<i64: 16, 128>}, {transform_indices = @transform_1, window_bounds = array<i64: 16, 128>}, {transform_indices = @transform_2, window_bounds = array<i64: 16, 128>}, {transform_indices = @transform_3, window_bounds = array<i64: 16, 128>}, {transform_indices = @transform_4, window_bounds = array<i64: 8, 128>}, {transform_indices = @transform_5, window_bounds = array<i64: 8, 128>}, {transform_indices = @transform_6, window_bounds = array<i64: 8, 128>}]} {
    %c0_i32 = arith.constant 0 : i32
    %0 = arith.cmpi eq, %arg1, %c0_i32 : i32
    %1 = arith.extui %0 : i1 to i32
    %c0_i32_0 = arith.constant 0 : i32
    %2 = arith.cmpi ne, %1, %c0_i32_0 : i32
    scf.if %2 {
      %cst_26 = arith.constant 0.000000e+00 : f32
      %36 = vector.broadcast %cst_26 : f32 to vector<8x128xf32>
      %c0_27 = arith.constant 0 : index
      %c0_28 = arith.constant 0 : index
      %37 = vector.load %arg9[%c0_27, %c0_28] : memref<8x128xf32, #tpu.memory_space<vmem>>, vector<8x128xf32>
      tpu.vector_store %arg9[%c0_27, %c0_28], %36 {strides = array<i32>} : memref<8x128xf32, #tpu.memory_space<vmem>>, vector<8x128xf32>,
      %cst_29 = arith.constant 0.000000e+00 : f32
      %38 = vector.broadcast %cst_29 : f32 to vector<8x128xf32>
      %c0_30 = arith.constant 0 : index
      %c0_31 = arith.constant 0 : index
      %39 = vector.load %arg10[%c0_30, %c0_31] : memref<8x128xf32, #tpu.memory_space<vmem>>, vector<8x128xf32>
      tpu.vector_store %arg10[%c0_30, %c0_31], %38 {strides = array<i32>} : memref<8x128xf32, #tpu.memory_space<vmem>>, vector<8x128xf32>,
      %cst_32 = arith.constant 0.000000e+00 : f32
      %40 = vector.broadcast %cst_32 : f32 to vector<8x128xf32>
      %c0_33 = arith.constant 0 : index
      %c0_34 = arith.constant 0 : index
      %41 = vector.load %arg11[%c0_33, %c0_34] : memref<8x128xf32, #tpu.memory_space<vmem>>, vector<8x128xf32>
      tpu.vector_store %arg11[%c0_33, %c0_34], %40 {strides = array<i32>} : memref<8x128xf32, #tpu.memory_space<vmem>>, vector<8x128xf32>,
    } else {
    }
    %c0 = arith.constant 0 : index
    %c0_1 = arith.constant 0 : index
    %3 = vector.load %arg2[%c0, %c0_1] : memref<16x128xf32, #tpu.memory_space<vmem>>, vector<16x128xf32>
    %c0_2 = arith.constant 0 : index
    %c0_3 = arith.constant 0 : index
    %4 = vector.load %arg3[%c0_2, %c0_3] : memref<16x128xf32, #tpu.memory_space<vmem>>, vector<16x128xf32>
    %c0_4 = arith.constant 0 : index
    %c0_5 = arith.constant 0 : index
    %5 = vector.load %arg5[%c0_4, %c0_5] : memref<16x128xf32, #tpu.memory_space<vmem>>, vector<16x128xf32>
    %c0_6 = arith.constant 0 : index
    %c0_7 = arith.constant 0 : index
    %6 = vector.load %arg4[%c0_6, %c0_7] : memref<16x128xf32, #tpu.memory_space<vmem>>, vector<16x128xf32>
    %cst = arith.constant 1.000000e+00 : f32
    %7 = vector.broadcast %cst : f32 to vector<16x128xf32>
    %8 = arith.divf %7, %6 : vector<16x128xf32>
    %9 = arith.subf %3, %4 : vector<16x128xf32>
    %10 = arith.mulf %9, %8 : vector<16x128xf32>
    %11 = arith.mulf %3, %8 : vector<16x128xf32>
    %12 = arith.mulf %5, %10 : vector<16x128xf32>
    %cst_8 = arith.constant 1.000000e+00 : f32
    %13 = vector.broadcast %cst_8 : f32 to vector<16x128xf32>
    %14 = arith.subf %13, %5 : vector<16x128xf32>
    %15 = arith.mulf %14, %11 : vector<16x128xf32>
    %16 = math.absf %15 : vector<16x128xf32>
    %c0_9 = arith.constant 0 : index
    %c0_10 = arith.constant 0 : index
    %17 = vector.load %arg9[%c0_9, %c0_10] : memref<8x128xf32, #tpu.memory_space<vmem>>, vector<8x128xf32>
    %18 = arith.mulf %12, %12 : vector<16x128xf32>
    %19 = vector.shape_cast %18 : vector<16x128xf32> to vector<2x8x128xf32>
    %cst_11 = arith.constant dense<0.000000e+00> : vector<8x128xf32>
    %20 = vector.multi_reduction <add>, %19, %cst_11 [0] : vector<2x8x128xf32> to vector<8x128xf32>
    %21 = arith.addf %17, %20 : vector<8x128xf32>
    %c0_12 = arith.constant 0 : index
    %c0_13 = arith.constant 0 : index
    %22 = vector.load %arg9[%c0_12, %c0_13] : memref<8x128xf32, #tpu.memory_space<vmem>>, vector<8x128xf32>
    tpu.vector_store %arg9[%c0_12, %c0_13], %21 {strides = array<i32>} : memref<8x128xf32, #tpu.memory_space<vmem>>, vector<8x128xf32>,
    %c0_14 = arith.constant 0 : index
    %c0_15 = arith.constant 0 : index
    %23 = vector.load %arg10[%c0_14, %c0_15] : memref<8x128xf32, #tpu.memory_space<vmem>>, vector<8x128xf32>
    %24 = vector.shape_cast %16 : vector<16x128xf32> to vector<2x8x128xf32>
    %cst_16 = arith.constant dense<0.000000e+00> : vector<8x128xf32>
    %25 = vector.multi_reduction <add>, %24, %cst_16 [0] : vector<2x8x128xf32> to vector<8x128xf32>
    %26 = arith.addf %23, %25 : vector<8x128xf32>
    %c0_17 = arith.constant 0 : index
    %c0_18 = arith.constant 0 : index
    %27 = vector.load %arg10[%c0_17, %c0_18] : memref<8x128xf32, #tpu.memory_space<vmem>>, vector<8x128xf32>
    tpu.vector_store %arg10[%c0_17, %c0_18], %26 {strides = array<i32>} : memref<8x128xf32, #tpu.memory_space<vmem>>, vector<8x128xf32>,
    %c0_19 = arith.constant 0 : index
    %c0_20 = arith.constant 0 : index
    %28 = vector.load %arg11[%c0_19, %c0_20] : memref<8x128xf32, #tpu.memory_space<vmem>>, vector<8x128xf32>
    %29 = vector.shape_cast %5 : vector<16x128xf32> to vector<2x8x128xf32>
    %cst_21 = arith.constant dense<0.000000e+00> : vector<8x128xf32>
    %30 = vector.multi_reduction <add>, %29, %cst_21 [0] : vector<2x8x128xf32> to vector<8x128xf32>
    %31 = arith.addf %28, %30 : vector<8x128xf32>
    %c0_22 = arith.constant 0 : index
    %c0_23 = arith.constant 0 : index
    %32 = vector.load %arg11[%c0_22, %c0_23] : memref<8x128xf32, #tpu.memory_space<vmem>>, vector<8x128xf32>
    tpu.vector_store %arg11[%c0_22, %c0_23], %31 {strides = array<i32>} : memref<8x128xf32, #tpu.memory_space<vmem>>, vector<8x128xf32>,
    %c0_i32_24 = arith.constant 0 : i32
    %33 = arith.cmpi eq, %arg1, %c0_i32_24 : i32
    %34 = arith.extui %33 : i1 to i32
    %c0_i32_25 = arith.constant 0 : i32
    %35 = arith.cmpi ne, %34, %c0_i32_25 : i32
    scf.if %35 {
      %c0_26 = arith.constant 0 : index
      %c0_27 = arith.constant 0 : index
      %36 = vector.load %arg9[%c0_26, %c0_27] : memref<8x128xf32, #tpu.memory_space<vmem>>, vector<8x128xf32>
      %c0_28 = arith.constant 0 : index
      %c0_29 = arith.constant 0 : index
      %37 = vector.load %arg6[%c0_28, %c0_29] : memref<8x128xf32, #tpu.memory_space<vmem>>, vector<8x128xf32>
      tpu.vector_store %arg6[%c0_28, %c0_29], %36 {strides = array<i32>} : memref<8x128xf32, #tpu.memory_space<vmem>>, vector<8x128xf32>,
      %c0_30 = arith.constant 0 : index
      %c0_31 = arith.constant 0 : index
      %38 = vector.load %arg10[%c0_30, %c0_31] : memref<8x128xf32, #tpu.memory_space<vmem>>, vector<8x128xf32>
      %c0_32 = arith.constant 0 : index
      %c0_33 = arith.constant 0 : index
      %39 = vector.load %arg7[%c0_32, %c0_33] : memref<8x128xf32, #tpu.memory_space<vmem>>, vector<8x128xf32>
      tpu.vector_store %arg7[%c0_32, %c0_33], %38 {strides = array<i32>} : memref<8x128xf32, #tpu.memory_space<vmem>>, vector<8x128xf32>,
      %c0_34 = arith.constant 0 : index
      %c0_35 = arith.constant 0 : index
      %40 = vector.load %arg11[%c0_34, %c0_35] : memref<8x128xf32, #tpu.memory_space<vmem>>, vector<8x128xf32>
      %c0_36 = arith.constant 0 : index
      %c0_37 = arith.constant 0 : index
      %41 = vector.load %arg8[%c0_36, %c0_37] : memref<8x128xf32, #tpu.memory_space<vmem>>, vector<8x128xf32>
      tpu.vector_store %arg8[%c0_36, %c0_37], %40 {strides = array<i32>} : memref<8x128xf32, #tpu.memory_space<vmem>>, vector<8x128xf32>,
    } else {
    }
    return
  }
  func.func @transform_0(%arg0: i32, %arg1: i32) -> (i32, i32) {
    %c1_i32 = arith.constant 1 : i32
    %0 = arith.muli %arg0, %c1_i32 : i32
    %1 = arith.addi %0, %arg1 : i32
    %c0_i32 = arith.constant 0 : i32
    %c0_i32_0 = arith.constant 0 : i32
    return %1, %c0_i32 : i32, i32
  }
  func.func @transform_1(%arg0: i32, %arg1: i32) -> (i32, i32) {
    %c1_i32 = arith.constant 1 : i32
    %0 = arith.muli %arg0, %c1_i32 : i32
    %1 = arith.addi %0, %arg1 : i32
    %c0_i32 = arith.constant 0 : i32
    %c0_i32_0 = arith.constant 0 : i32
    return %1, %c0_i32 : i32, i32
  }
  func.func @transform_2(%arg0: i32, %arg1: i32) -> (i32, i32) {
    %c1_i32 = arith.constant 1 : i32
    %0 = arith.muli %arg0, %c1_i32 : i32
    %1 = arith.addi %0, %arg1 : i32
    %c0_i32 = arith.constant 0 : i32
    %c0_i32_0 = arith.constant 0 : i32
    return %1, %c0_i32 : i32, i32
  }
  func.func @transform_3(%arg0: i32, %arg1: i32) -> (i32, i32) {
    %c1_i32 = arith.constant 1 : i32
    %0 = arith.muli %arg0, %c1_i32 : i32
    %1 = arith.addi %0, %arg1 : i32
    %c0_i32 = arith.constant 0 : i32
    %c0_i32_0 = arith.constant 0 : i32
    return %1, %c0_i32 : i32, i32
  }
  func.func @transform_4(%arg0: i32, %arg1: i32) -> (i32, i32) {
    %c0_i32 = arith.constant 0 : i32
    %c0_i32_0 = arith.constant 0 : i32
    return %arg0, %c0_i32 : i32, i32
  }
  func.func @transform_5(%arg0: i32, %arg1: i32) -> (i32, i32) {
    %c0_i32 = arith.constant 0 : i32
    %c0_i32_0 = arith.constant 0 : i32
    return %arg0, %c0_i32 : i32, i32
  }
  func.func @transform_6(%arg0: i32, %arg1: i32) -> (i32, i32) {
    %c0_i32 = arith.constant 0 : i32
    %c0_i32_0 = arith.constant 0 : i32
    return %arg0, %c0_i32 : i32, i32
  }
}

</mosaic_0001>

<bundles_post_ra>
// kernel: tpu_custom_call.1
= control target key start
LH: loop header
LB: loop body
LE: loop exit
PB: predicated region body
PF: predicated region fallthrough
CT: control target
= control target key end

     0   :  { %12 = vsyncpa [#allocation6], 0  ;;  %s441_s0 = inlined_call_operand.hbm [shape: f32[16,128], index: 0, kind: input, shape index: {}]   ;;  %s442_s1 = inlined_call_operand.hbm [shape: f32[16,128], index: 1, kind: input, shape index: {}]   ;;  %s443_s2 = inlined_call_operand.hbm [shape: f32[16,128], index: 2, kind: input, shape index: {}]   ;;  %s444_s3 = inlined_call_operand.hbm [shape: f32[16,128], index: 3, kind: input, shape index: {}]   ;;  %s445_s4 = inlined_call_operand.hbm [shape: f32[8,128], index: 4, kind: output, shape index: {0}]   ;;  %s446_s5 = inlined_call_operand.hbm [shape: f32[8,128], index: 5, kind: output, shape index: {1}]   ;;  %s447_s6 = inlined_call_operand.hbm [shape: f32[8,128], index: 6, kind: output, shape index: {2}]  }
   0x1   :  { %13 = vsyncpa [#allocation9], 0 }
   0x2   :  { %14 = vsyncpa [#allocation12], 0 }
   0x3   :  { %15 = vsyncpa [#allocation7], 0 }
   0x4   :  { %16 = vsyncpa [#allocation15], 0  ;;  %s364_s21 = smov [#allocation8]   ;;  %s365_s23 = smov [#allocation5]  }
   0x5   :  { %s42_s22 = sshll.u32 %s364_s21, 4  ;;  %s26_s24 = sshll.u32 %s365_s23, 4  ;;  %s43_s22 = int_to_ptr.vmem [resolvable:$true] %s42_s22  ;;  %s27_s24 = int_to_ptr.vmem [resolvable:$true] %s26_s24 }
   0x6   :  { %s222_s25 = scalar_lea.vmem %s43_s22, 256  ;;  %p227_p1 = scmp.lt.s32.totalorder %s43_s22, %s43_s22 }
   0x7   :  { %p223_p0 = scmp.ne.s32.totalorder %s43_s22, %s222_s25  ;;  %p228_p2 = scmp.lt.s32.totalorder %s222_s25, %s222_s25 }
   0x9   :  { %p229_p3 = por %p228_p2, %p227_p1 }
   0xb   :  { %p230_p4 = pnand %p229_p3, %p223_p0 }
   0xd   :  { %233 = shalt.err (!%p230_p4)
}
   0xe   :  { %s366_s26 = smov 128   ;;  %s367_s27 = smov 8  }
   0xf   :  { %48 = dma.hbm_to_vmem [thread:$0]  %s442_s1, 256, %s43_s22, [#allocation9], %s366_s26, %s366_s26, %s367_s27  }
  0x10   :  { %s242_s30 = scalar_lea.vmem %s27_s24, 256  ;;  %p247_p6 = scmp.lt.s32.totalorder %s27_s24, %s27_s24 }
  0x11   :  { %p243_p5 = scmp.ne.s32.totalorder %s27_s24, %s242_s30  ;;  %p248_p7 = scmp.lt.s32.totalorder %s242_s30, %s242_s30 }
  0x13   :  { %p249_p8 = por %p248_p7, %p247_p6 }
  0x15   :  { %p250_p9 = pnand %p249_p8, %p243_p5 }
  0x17   :  { %253 = shalt.err (!%p250_p9)
}
  0x18   :  { %32 = dma.hbm_to_vmem [thread:$0]  %s441_s0, 256, %s27_s24, [#allocation6], %s366_s26, %s366_s26, %s367_s27  }
  0x19   :  { %s368_s9 = smov [#allocation10]   ;;  %s369_s11 = smov [#allocation11]  }
  0x1a   :  { %s58_s10 = sshll.u32 %s368_s9, 4  ;;  %s74_s12 = sshll.u32 %s369_s11, 4  ;;  %s59_s10 = int_to_ptr.vmem [resolvable:$true] %s58_s10  ;;  %s75_s12 = int_to_ptr.vmem [resolvable:$true] %s74_s12 }
  0x1b   :  { %s262_s1 = scalar_lea.vmem %s59_s10, 256  ;;  %p267_p11 = scmp.lt.s32.totalorder %s59_s10, %s59_s10 }
  0x1c   :  { %p263_p10 = scmp.ne.s32.totalorder %s59_s10, %s262_s1  ;;  %p268_p12 = scmp.lt.s32.totalorder %s262_s1, %s262_s1 }
  0x1e   :  { %p269_p13 = por %p268_p12, %p267_p11 }
  0x20   :  { %p270_p0 = pnand %p269_p13, %p263_p10 }
  0x22   :  { %273 = shalt.err (!%p270_p0)
}
  0x23   :  { %64 = dma.hbm_to_vmem [thread:$0]  %s443_s2, 256, %s59_s10, [#allocation9], %s366_s26, %s366_s26, %s367_s27  }
  0x24   :  { %s282_s0 = scalar_lea.vmem %s75_s12, 256  ;;  %p287_p2 = scmp.lt.s32.totalorder %s75_s12, %s75_s12 }
  0x25   :  { %p283_p1 = scmp.ne.s32.totalorder %s75_s12, %s282_s0  ;;  %p288_p3 = scmp.lt.s32.totalorder %s282_s0, %s282_s0 }
  0x27   :  { %p289_p4 = por %p288_p3, %p287_p2 }
  0x29   :  { %p290_p5 = pnand %p289_p4, %p283_p1 }
  0x2b   :  { %293 = shalt.err (!%p290_p5)
}
  0x2c   :  { %80 = dma.hbm_to_vmem [thread:$0]  %s444_s3, 256, %s75_s12, [#allocation12], %s366_s26, %s366_s26, %s367_s27  }
  0x2d   :  { %354 = dma.done.wait [#allocation6], 256  }
  0x2e   :  { %355 = vsyncadd [#allocation6], 4294967040 }
  0x2f   :  { %356 = dma.done.wait [#allocation9], 512  }
  0x30   :  { %357 = vsyncadd [#allocation9], 4294966784 }
  0x31   :  { %358 = dma.done.wait [#allocation12], 256  }
  0x32   :  { %359 = vsyncadd [#allocation12], 4294967040  ;;  %v112_v0 = vld [vmem:[#allocation11] sm:$0xff]  ;;  %v113_v1 = vld [vmem:[#allocation11 + $0x8] sm:$0xff]  ;;  %s370_s2 = smov [#allocation14]   ;;  %s371_s17 = smov [#allocation13]  }
  0x33   :  { %v114_v2 = vld [vmem:[#allocation10] sm:$0xff]  ;;  %v115_v3 = vld [vmem:[#allocation10 + $0x8] sm:$0xff]  ;;  %v145_v4 = vadd.f32 %v113_v1, %v112_v0  ;;  %v110_v6 = vld [vmem:[#allocation8] sm:$0xff]  ;;  %v128_v11 = vsub.f32 1.0, %v112_v0  ;;  %v129_v13 = vsub.f32 1.0, %v113_v1  ;;  %s173_s3 = sshll.u32 %s370_s2, 4  ;;  %s174_s3 = int_to_ptr.vmem [resolvable:$true] %s173_s3 }
  0x34   :  { %210 = vrcp.f32 %v114_v2  ;;  %v108_v5 = vld [vmem:[#allocation5] sm:$0xff]  ;;  %v109_v7 = vld [vmem:[#allocation5 + $0x8] sm:$0xff]  ;;  %v111_v8 = vld [vmem:[#allocation8 + $0x8] sm:$0xff]  ;;  %s163_s18 = sshll.u32 %s371_s17, 4  ;;  %s372_s19 = smov [#allocation16]   ;;  %s164_s18 = int_to_ptr.vmem [resolvable:$true] %s163_s18 }
  0x35   :  { %212 = vrcp.f32 %v115_v3  ;;  %156 = vst [vmem:[#allocation16] sm:$0xff] %v145_v4  ;;  %v120_v9 = vsub.f32 %v108_v5, %v110_v6  ;;  %v121_v10 = vsub.f32 %v109_v7, %v111_v8  ;;  %s183_s20 = sshll.u32 %s372_s19, 4  ;;  %s294_s21 = scalar_lea.vmem %s174_s3, 128  ;;  %s184_s20 = int_to_ptr.vmem [resolvable:$true] %s183_s20 }
  0x36   :  { %p295_p6 = scmp.ne.s32.totalorder %s174_s3, %s294_s21  ;;  %p299_p7 = scmp.lt.s32.totalorder %s174_s3, %s174_s3 }
  0x37   :  { %p300_p8 = scmp.lt.s32.totalorder %s294_s21, %s294_s21 }
  0x39   :  { %p301_p9 = por %p300_p8, %p299_p7 }
  0x3b   :  { %p302_p10 = pnand %p301_p9, %p295_p6 }
  0x41   :  { %v211_v12 = vpop.eup %210 }
  0x42   :  { %v213_v14 = vpop.eup %212  ;;  %v124_v15 = vmul.f32 %v211_v12, %v108_v5  ;;  %v122_v16 = vmul.f32 %v211_v12, %v120_v9 }
  0x43   :  { %v125_v17 = vmul.f32 %v213_v14, %v109_v7  ;;  %v123_v18 = vmul.f32 %v213_v14, %v121_v10 }
  0x44   :  { %v130_v19 = vmul.f32 %v128_v11, %v124_v15  ;;  %v126_v20 = vmul.f32 %v122_v16, %v112_v0 }
  0x45   :  { %v131_v21 = vmul.f32 %v129_v13, %v125_v17  ;;  %v127_v22 = vmul.f32 %v123_v18, %v113_v1 }
  0x46   :  { %v132_v23 = vand.u32 2147483647, %v130_v19  ;;  %v135_v24 = vmul.f32 %v126_v20, %v126_v20 }
  0x47   :  { %v133_v25 = vand.u32 2147483647, %v131_v21  ;;  %v136_v26 = vmul.f32 %v127_v22, %v127_v22 }
  0x49   :  { %v141_v27 = vadd.f32 %v133_v25, %v132_v23  ;;  %v137_v28 = vadd.f32 %v136_v26, %v135_v24 }
  0x4b   :  { %154 = vst [vmem:[#allocation14] sm:$0xff] %v141_v27  ;;  %152 = vst [vmem:[#allocation13] sm:$0xff] %v137_v28 }
  0x4c   :  { %305 = shalt.err (!%p302_p10)
}
  0x4d   :  { %176 = dma.vmem_to_hbm [thread:$0]  %s174_s3, 128, %s446_s5, [#allocation15]  }
  0x4e   :  { %s314_s24 = scalar_lea.vmem %s164_s18, 128  ;;  %p319_p12 = scmp.lt.s32.totalorder %s164_s18, %s164_s18 }
  0x4f   :  { %p315_p11 = scmp.ne.s32.totalorder %s164_s18, %s314_s24  ;;  %p320_p13 = scmp.lt.s32.totalorder %s314_s24, %s314_s24 }
  0x51   :  { %p321_p0 = por %p320_p13, %p319_p12 }
  0x53   :  { %p322_p1 = pnand %p321_p0, %p315_p11 }
  0x55   :  { %325 = shalt.err (!%p322_p1)
}
  0x56   :  { %166 = dma.vmem_to_hbm [thread:$0]  %s164_s18, 128, %s445_s4, [#allocation7]  }
  0x57   :  { %s334_s27 = scalar_lea.vmem %s184_s20, 128  ;;  %p339_p3 = scmp.lt.s32.totalorder %s184_s20, %s184_s20 }
  0x58   :  { %p335_p2 = scmp.ne.s32.totalorder %s184_s20, %s334_s27  ;;  %p340_p4 = scmp.lt.s32.totalorder %s334_s27, %s334_s27 }
  0x5a   :  { %p341_p5 = por %p340_p4, %p339_p3 }
  0x5c   :  { %p342_p6 = pnand %p341_p5, %p335_p2 }
  0x5e   :  { %345 = shalt.err (!%p342_p6)
}
  0x5f   :  { %186 = dma.vmem_to_hbm [thread:$0]  %s184_s20, 128, %s447_s6, [#allocation15]  }
  0x60   :  { %360 = dma.done.wait [#allocation7], 128  }
  0x61   :  { %361 = vsyncadd [#allocation7], 4294967168 }
  0x62   :  { %362 = dma.done.wait [#allocation15], 256  }
  0x63   :  { %363 = vsyncadd [#allocation15], 4294967040 }
  0x64   :  { %196 = vsyncpa [#allocation6], 1 }
  0x65   :  { %197 = vsyncpa [#allocation9], 1 }
  0x66   :  { %198 = vsyncpa [#allocation12], 1 }
  0x67   :  { %199 = vsyncpa [#allocation7], 1 }
  0x68   :  { %200 = vsyncpa [#allocation15], 1 }

</bundles_post_ra>
